<compile_context>
chip_gen: v5e
topology: v5e:2x2
jax: 0.10.0
libtpu: 0.0.40
codegen_flags: <defaults>
</compile_context>

<pallas_src>
import jax
import jax.numpy as jnp
from jax.experimental import pallas as pl
from jax.experimental.pallas import tpu as pltpu

EPS = 1e-5


@jax.jit
def model_forward(x, weight, bias, gamma, beta):
    """x: (N, Cin, H, W) f32 NCHW  ->  (N, Cout, Hout, Wout) f32 NCHW."""
    N, Cin, H, W = x.shape
    Cout, _, KH, KW = weight.shape
    stride, pad, dil = 2, 2, 2

    Hout = (H + 2 * pad - dil * (KH - 1) - 1) // stride + 1
    Wout = (W + 2 * pad - dil * (KW - 1) - 1) // stride + 1

    # stride == dilation => every sampled index (stride*i + dil*kh) is a multiple of
    # dil, so the dilated, strided conv is a dense stride-1 conv on the even
    # sub-lattice of the padded input.
    assert stride == dil, "layout trick assumes stride == dilation"
    xp = jnp.pad(x, ((0, 0), (0, 0), (pad, pad), (pad, pad)))
    xe = xp[:, :, ::dil, ::dil]                              # (N, Cin, He, We)
    He, We = xe.shape[2], xe.shape[3]
    assert Hout + KH - 1 <= He and Wout + KW - 1 <= We

    count = N * Hout * Wout                                  # valid output positions
    Mw = ((count + 127) // 128) * 128                        # lane-dense width
    K = KH * KW * Cin
    Kp = ((K + 31) // 32) * 32                               # padded contraction dim

    # im2col over the sub-lattice:
    #   xs[(kh*KW+kw)*Cin + c, n*Hout*Wout + i*Wout + j] = xe[n, c, i+kh, j+kw]
    # Only valid positions are materialized, so no garbage lanes enter the BN stats.
    patches = [xe[:, :, kh:kh + Hout, kw:kw + Wout]
               for kh in range(KH) for kw in range(KW)]      # each (N, Cin, Hout, Wout)
    xs = jnp.stack(patches, axis=0)                          # (KH*KW, N, Cin, Hout, Wout)
    xs = xs.transpose(0, 2, 1, 3, 4).reshape(K, count)       # (K, count), K-order (tap, c)
    xs = jnp.pad(xs, ((0, Kp - K), (0, Mw - count)))
    xs = xs.astype(jnp.bfloat16)                             # MXU operand in bf16

    # Weights as one dense (Cout, Kp) bf16 slab, matching the K-order of xs.
    w2 = weight.transpose(0, 2, 3, 1).reshape(Cout, K)
    w2 = jnp.pad(w2, ((0, 0), (0, Kp - K))).astype(jnp.bfloat16)

    # bias / gamma / beta in a single (Cout, 3) slab -> one parameter DMA.
    params = jnp.stack([bias, gamma, beta], axis=1).astype(jnp.float32)

    inv_count = 1.0 / float(count)
    needs_lane_mask = (Mw != count)

    def _fused_kernel(xs_ref, w_ref, p_ref, o_ref):
        # Single K=Kp bf16 matmul with f32 accumulation: bias-free conv, all positions.
        acc = jnp.dot(w_ref[...], xs_ref[...],
                      preferred_element_type=jnp.float32)            # (Cout, Mw) f32
        if needs_lane_mask:
            lane = jax.lax.broadcasted_iota(jnp.int32, (1, Mw), 1)
            valid = lane < count
            acc_s = jnp.where(valid, acc, 0.0)
        else:
            acc_s = acc
        b = p_ref[:, 0:1]                                            # conv bias
        g = p_ref[:, 1:2]                                            # BN gamma
        be = p_ref[:, 2:3]                                           # BN beta
        # BatchNorm (training mode) batch statistics; the conv bias cancels inside
        # (v1 - mean), so the statistics use the bias-free accumulator.
        mean0 = jnp.sum(acc_s, axis=1, keepdims=True) * inv_count
        cen = acc - mean0                                            # == v1 - mean(v1)
        cen_s = jnp.where(valid, cen, 0.0) if needs_lane_mask else cen
        var = jnp.sum(cen_s * cen_s, axis=1, keepdims=True) * inv_count
        v3 = cen * jax.lax.rsqrt(var + EPS) * g + be                 # batch_norm(v1)
        v2 = jnp.maximum(acc + b, 0.0)                               # relu(v1)
        v4 = jax.nn.sigmoid(v2 + v3)
        o_ref[...] = (v3 * v4).astype(o_ref.dtype)

    vmem = pltpu.MemorySpace.VMEM
    out_wide = pl.pallas_call(
        _fused_kernel,
        out_shape=jax.ShapeDtypeStruct((Cout, Mw), jnp.float32),
        in_specs=[pl.BlockSpec(memory_space=vmem)] * 3,
        out_specs=pl.BlockSpec(memory_space=vmem),
    )(xs, w2, params)

    # Keep only the valid lane-dense positions and return NCHW.
    out = out_wide[:, :count].reshape(Cout, N, Hout, Wout)
    return out.transpose(1, 0, 2, 3)


def _reference(x, weight, bias, gamma, beta):
    """Plain-JAX reference of the module forward (f32, highest precision)."""
    v1 = jax.lax.conv_general_dilated(
        x, weight, window_strides=(2, 2), padding=((2, 2), (2, 2)),
        rhs_dilation=(2, 2), dimension_numbers=("NCHW", "OIHW", "NCHW"),
        precision=jax.lax.Precision.HIGHEST,
    ) + bias.reshape(1, -1, 1, 1)
    v2 = jnp.maximum(v1, 0.0)
    mean = jnp.mean(v1, axis=(0, 2, 3), keepdims=True)
    var = jnp.mean((v1 - mean) ** 2, axis=(0, 2, 3), keepdims=True)
    v3 = (v1 - mean) * jax.lax.rsqrt(var + EPS) * gamma.reshape(1, -1, 1, 1) \
         + beta.reshape(1, -1, 1, 1)
    v4 = jax.nn.sigmoid(v2 + v3)
    return v3 * v4


if __name__ == "__main__":
    key = jax.random.PRNGKey(0)
    kx, kw, kb = jax.random.split(key, 3)

    # Small shapes consistent with the forward: NCHW input with 3 channels.
    N, Cin, H, W = 2, 3, 16, 16
    Cout, KH, KW = 16, 3, 3

    x = jax.random.normal(kx, (N, Cin, H, W), dtype=jnp.float32)

    # Deterministic parameter init (Conv2d-style fan-in scaling).
    fan_in = Cin * KH * KW
    bound = 1.0 / (fan_in ** 0.5)
    weight = jax.random.uniform(kw, (Cout, Cin, KH, KW), jnp.float32, -bound, bound)
    bias = jax.random.uniform(kb, (Cout,), jnp.float32, -bound, bound)
    gamma = jnp.ones((Cout,), jnp.float32)   # BatchNorm2d default weight
    beta = jnp.zeros((Cout,), jnp.float32)   # BatchNorm2d default bias

    out = model_forward(x, weight, bias, gamma, beta)
    jax.block_until_ready(out)
    assert out.shape == (N, Cout, 8, 8), out.shape

    # Tight check: reference fed bf16-quantized conv operands (isolates kernel logic
    # from the intentional bf16 MXU-operand cast).
    xq = x.astype(jnp.bfloat16).astype(jnp.float32)
    wq = weight.astype(jnp.bfloat16).astype(jnp.float32)
    ref_q = _reference(xq, wq, bias, gamma, beta)
    err_q = float(jnp.max(jnp.abs(out - ref_q)))
    assert err_q < 2e-3, f"max abs error vs bf16-operand reference: {err_q}"

    # Loose check against the full-f32 module forward (bounds the bf16 operand cast).
    ref = _reference(x, weight, bias, gamma, beta)
    err = float(jnp.max(jnp.abs(out - ref)))
    assert err < 5e-2, f"max abs error vs f32 reference: {err}"

    print("KERNEL_OK")
</pallas_src>

<mosaic_0001>
module attributes {stable_mosaic.version = 11 : i64} {
  func.func @_fused_kernel(%arg0: memref<32x128xbf16, #tpu.memory_space<vmem>>, %arg1: memref<16x32xbf16, #tpu.memory_space<vmem>>, %arg2: memref<16x3xf32, #tpu.memory_space<vmem>>, %arg3: memref<16x128xf32, #tpu.memory_space<vmem>>) attributes {dimension_semantics = [], scalar_prefetch = 0 : i64, scratch_operands = 0 : i64, tpu.core_type = #tpu.core_type<tc>} {
    %c0 = arith.constant 0 : index
    %c0_0 = arith.constant 0 : index
    %0 = vector.load %arg1[%c0, %c0_0] : memref<16x32xbf16, #tpu.memory_space<vmem>>, vector<16x32xbf16>
    %c0_1 = arith.constant 0 : index
    %c0_2 = arith.constant 0 : index
    %1 = vector.load %arg0[%c0_1, %c0_2] : memref<32x128xbf16, #tpu.memory_space<vmem>>, vector<32x128xbf16>
    %cst = arith.constant dense<0.000000e+00> : vector<16x128xf32>
    %2 = tpu.matmul %0, %1, %cst {dimension_numbers = #tpu.dot_dimension_numbers<[1], [0], [0], [1], [0, 0, 1, 1], [], []>} : vector<16x32xbf16>, vector<32x128xbf16>, vector<16x128xf32> -> vector<16x128xf32>
    %c0_3 = arith.constant 0 : index
    %c0_4 = arith.constant 0 : index
    %3 = vector.load %arg2[%c0_3, %c0_4] : memref<16x3xf32, #tpu.memory_space<vmem>>, vector<16x1xf32>
    %c0_5 = arith.constant 0 : index
    %c1 = arith.constant 1 : index
    %4 = vector.load %arg2[%c0_5, %c1] : memref<16x3xf32, #tpu.memory_space<vmem>>, vector<16x1xf32>
    %c0_6 = arith.constant 0 : index
    %c2 = arith.constant 2 : index
    %5 = vector.load %arg2[%c0_6, %c2] : memref<16x3xf32, #tpu.memory_space<vmem>>, vector<16x1xf32>
    %cst_7 = arith.constant dense<0.000000e+00> : vector<16xf32>
    %6 = vector.multi_reduction <add>, %2, %cst_7 [1] : vector<16x128xf32> to vector<16xf32>
    %7 = vector.shape_cast %6 : vector<16xf32> to vector<16x1xf32>
    %cst_8 = arith.constant 7.812500e-03 : f32
    %8 = vector.broadcast %cst_8 : f32 to vector<16x1xf32>
    %9 = arith.mulf %7, %8 : vector<16x1xf32>
    %10 = vector.broadcast %9 : vector<16x1xf32> to vector<16x128xf32>
    %11 = arith.subf %2, %10 : vector<16x128xf32>
    %12 = arith.mulf %11, %11 : vector<16x128xf32>
    %cst_9 = arith.constant dense<0.000000e+00> : vector<16xf32>
    %13 = vector.multi_reduction <add>, %12, %cst_9 [1] : vector<16x128xf32> to vector<16xf32>
    %14 = vector.shape_cast %13 : vector<16xf32> to vector<16x1xf32>
    %cst_10 = arith.constant 7.812500e-03 : f32
    %15 = vector.broadcast %cst_10 : f32 to vector<16x1xf32>
    %16 = arith.mulf %14, %15 : vector<16x1xf32>
    %cst_11 = arith.constant 9.99999974E-6 : f32
    %17 = vector.broadcast %cst_11 : f32 to vector<16x1xf32>
    %18 = arith.addf %16, %17 : vector<16x1xf32>
    %19 = math.rsqrt %18 : vector<16x1xf32>
    %20 = vector.broadcast %19 : vector<16x1xf32> to vector<16x128xf32>
    %21 = arith.mulf %11, %20 : vector<16x128xf32>
    %22 = vector.broadcast %4 : vector<16x1xf32> to vector<16x128xf32>
    %23 = arith.mulf %21, %22 : vector<16x128xf32>
    %24 = vector.broadcast %5 : vector<16x1xf32> to vector<16x128xf32>
    %25 = arith.addf %23, %24 : vector<16x128xf32>
    %26 = vector.broadcast %3 : vector<16x1xf32> to vector<16x128xf32>
    %27 = arith.addf %2, %26 : vector<16x128xf32>
    %cst_12 = arith.constant 0.000000e+00 : f32
    %28 = vector.broadcast %cst_12 : f32 to vector<16x128xf32>
    %29 = arith.maximumf %27, %28 : vector<16x128xf32>
    %30 = arith.addf %29, %25 : vector<16x128xf32>
    %31 = arith.negf %30 : vector<16x128xf32>
    %32 = math.exp %31 : vector<16x128xf32>
    %cst_13 = arith.constant 1.000000e+00 : f32
    %33 = vector.broadcast %cst_13 : f32 to vector<16x128xf32>
    %34 = arith.addf %33, %32 : vector<16x128xf32>
    %35 = arith.divf %33, %34 : vector<16x128xf32>
    %36 = arith.mulf %25, %35 : vector<16x128xf32>
    %c0_14 = arith.constant 0 : index
    %c0_15 = arith.constant 0 : index
    %37 = vector.load %arg3[%c0_14, %c0_15] : memref<16x128xf32, #tpu.memory_space<vmem>>, vector<16x128xf32>
    tpu.vector_store %arg3[%c0_14, %c0_15], %36 {strides = array<i32>} : memref<16x128xf32, #tpu.memory_space<vmem>>, vector<16x128xf32>,
    return
  }
}

</mosaic_0001>

<bundles_post_ra>
// kernel: model_forward.1
= control target key start
LH: loop header
LB: loop body
LE: loop exit
PB: predicated region body
PF: predicated region fallthrough
CT: control target
= control target key end

     0   :  { %vm38_vm0 = vcmask 261120   ;;  %v217_v3 = vmov 0   ;;  %v218_v7 = vmov 1   ;;  %v219_v17 = vmov 2   ;;  %s266_s0 = inlined_call_operand.vmem [shape: bf16[32,128], index: 0, kind: input, shape index: {}]   ;;  %s267_s1 = inlined_call_operand.vmem [shape: bf16[16,32], index: 1, kind: input, shape index: {}]   ;;  %s268_s2 = inlined_call_operand.vmem [shape: f32[16,3], index: 2, kind: input, shape index: {}]   ;;  %s269_s3 = inlined_call_operand.vmem [shape: f32[16,128], index: 3, kind: output, shape index: {}]  }
   0x1   :  { %v197_v0 = vld [vmem:[%s266_s0 + $0x8] sm:$0xff]  ;;  %v196_v1 = vld [vmem:[%s266_s0] sm:$0xff]  ;;  %202 = vset.pattern.permute.xlu0 %v217_v3  ;;  %203 = vset.pattern.permute.xlu1 %v217_v3 }
   0x2   :  { %48 = vmatpush.bf16.msra.mxu0 %v197_v0  ;;  %v195_v2 = vld [vmem:[%s267_s1] sm:$0xff]  ;;  %201 = vset.pattern.permute.xlu2 %v218_v7  ;;  %v57_v12 = vld [vmem:[%s268_s2 + $0x8] sm:$0xff] }
   0x3   :  { %v56_v6 = vld [vmem:[%s268_s2] sm:$0xff] }
   0x4   :  { %100 = vperm.xlu2 %201, %v56_v6  }
   0x6   :  { %49 = vmatpush.bf16.msra.mxu0 %v196_v1 }
   0x9   :  { %192 = vmatmul.msk.bf16.vlgmr.msra.gmra.mxu0 %vm38_vm0, %v195_v2 }
   0xc   :  { %105 = vperm.xlu2 %201, %v57_v12  }
  0x14   :  { %204 = vset.pattern.permute.xlu2 %v219_v17 }
  0x15   :  { %111 = vperm.xlu2 %204, %v56_v6  }
  0x1d   :  { %115 = vperm.xlu2 %204, %v57_v12  }
  0x5e   :  { %v101_v21 = vpop.permute.xlu2 %100 }
  0x66   :  { %v106_v28 = vpop.permute.xlu2 %105 }
  0x6f   :  { %v112_v40 = vpop.permute.xlu2 %111 }
  0x77   :  { %v116_v53 = vpop.permute.xlu2 %115 }
  0x86   :  { %v51_v4 = vpop.f32.mrf.mxu0 }
  0x87   :  { %58 = vadd.xlane.f32.xlu0 %v51_v4 }
  0x8e   :  { %v249_v5 = vpop.f32.mrf.mxu0 }
  0x8f   :  { %60 = vadd.xlane.f32.xlu0 %v249_v5 }
  0xa3   :  { %121 = vperm.xlu0 %202, %v56_v6  }
  0xfa   :  { %v59_v8 = vpop.xlane.xlu0 %58 }
  0xfb   :  { %v62_v9 = vmul.f32 0.0078125, %v59_v8 }
  0xfd   :  { %v64_v10 = vsub.f32 %v51_v4, %v62_v9 }
  0xff   :  { %v66_v11 = vmul.f32 %v64_v10, %v64_v10 }
 0x101   :  { %68 = vadd.xlane.f32.xlu1 %v66_v11 }
 0x102   :  { %v61_v13 = vpop.xlane.xlu0 %60 }
 0x103   :  { %v63_v14 = vmul.f32 0.0078125, %v61_v13 }
 0x105   :  { %v65_v15 = vsub.f32 %v249_v5, %v63_v14 }
 0x107   :  { %v67_v16 = vmul.f32 %v65_v15, %v65_v15 }
 0x109   :  { %70 = vadd.xlane.f32.xlu1 %v67_v16 }
 0x115   :  { %v122_v32 = vpop.permute.xlu0 %121 }
 0x116   :  { %v128_v37 = vadd.f32 %v122_v32, %v51_v4 }
 0x118   :  { %v130_v43 = vmax.f32 %v128_v37, 0.0 }
 0x122   :  { %125 = vperm.xlu1 %203, %v57_v12  }
 0x174   :  { %v69_v18 = vpop.xlane.xlu1 %68 }
 0x175   :  { %v72_v19 = vmul.f32 0.0078125, %v69_v18 }
 0x177   :  { %v74_v20 = vadd.f32 1e-05, %v72_v19 }
 0x179   :  { %205 = vrsqrt.f32 %v74_v20  ;;  %vm82_vm2 = vweird.f32 %v74_v20 }
 0x17c   :  { %v71_v22 = vpop.xlane.xlu1 %70 }
 0x17d   :  { %v73_v23 = vmul.f32 0.0078125, %v71_v22 }
 0x17f   :  { %v206_v24 = vpop.eup %205  ;;  %v75_v25 = vadd.f32 1e-05, %v73_v23 }
 0x180   :  { %v77_v26 = vmul.f32 %v206_v24, %v74_v20  ;;  %vm83_vm1 = vweird.f32 %v206_v24 }
 0x181   :  { %207 = vrsqrt.f32 %v75_v25  ;;  %vm84_vm3 = vmor %vm82_vm2, %vm83_vm1  ;;  %vm92_vm5 = vweird.f32 %v75_v25 }
 0x182   :  { %v78_v27 = vmul.f32 %v206_v24, %v77_v26 }
 0x184   :  { %v79_v29 = vmul.f32 0.5, %v78_v27 }
 0x186   :  { %v80_v30 = vsub.f32 1.5, %v79_v29 }
 0x187   :  { %v208_v31 = vpop.eup %207 }
 0x188   :  { %v81_v33 = vmul.f32 %v206_v24, %v80_v30  ;;  %v87_v34 = vmul.f32 %v208_v31, %v75_v25  ;;  %vm93_vm4 = vweird.f32 %v208_v31 }
 0x189   :  { %vm94_vm6 = vmor %vm92_vm5, %vm93_vm4 }
 0x18a   :  { %v85_v35 = vsel %vm84_vm3, %v206_v24, %v81_v33  ;;  %v88_v36 = vmul.f32 %v208_v31, %v87_v34 }
 0x18b   :  { %v96_v38 = vmul.f32 %v85_v35, %v64_v10 }
 0x18c   :  { %v89_v39 = vmul.f32 0.5, %v88_v36 }
 0x18d   :  { %v108_v41 = vmul.f32 %v101_v21, %v96_v38 }
 0x18e   :  { %v90_v42 = vsub.f32 1.5, %v89_v39 }
 0x18f   :  { %v118_v44 = vadd.f32 %v112_v40, %v108_v41 }
 0x190   :  { %v91_v45 = vmul.f32 %v208_v31, %v90_v42 }
 0x191   :  { %v132_v46 = vadd.f32 %v130_v43, %v118_v44 }
 0x192   :  { %v95_v47 = vsel %vm94_vm6, %v208_v31, %v91_v45 }
 0x193   :  { %v97_v48 = vmul.f32 %v95_v47, %v65_v15  ;;  %v193_v49 = vmul.f32 -1.442695, %v132_v46 }
 0x194   :  { %v126_v50 = vpop.permute.xlu1 %125 }
 0x195   :  { %v109_v51 = vmul.f32 %v106_v28, %v97_v48  ;;  %209 = vpow2.f32 %v193_v49  ;;  %v129_v52 = vadd.f32 %v126_v50, %v249_v5 }
 0x197   :  { %v119_v54 = vadd.f32 %v116_v53, %v109_v51  ;;  %v131_v55 = vmax.f32 %v129_v52, 0.0 }
 0x199   :  { %v133_v56 = vadd.f32 %v131_v55, %v119_v54 }
 0x19b   :  { %v210_v57 = vpop.eup %209  ;;  %v194_v58 = vmul.f32 -1.442695, %v133_v56 }
 0x19c   :  { %v140_v59 = vadd.f32 1.0, %v210_v57 }
 0x19d   :  { %211 = vpow2.f32 %v194_v58 }
 0x19e   :  { %213 = vrcp.f32 %v140_v59  ;;  %v153_v1 = vand.u32 2147483648, %v140_v59  ;;  %v151_v3 = vand.u32 2147483647, %v140_v59  ;;  %vm147_vm8 = vweird.f32 %v140_v59 }
 0x1a0   :  { %v154_v6 = vor.u32 1.1754944e-38, %v153_v1  ;;  %vm152_vm10 = vcmp.eq.f32.partialorder %v151_v3, 8.507059e+37 }
 0x1a3   :  { %v212_v60 = vpop.eup %211 }
 0x1a4   :  { %v214_v61 = vpop.eup %213  ;;  %v141_v62 = vadd.f32 1.0, %v212_v60 }
 0x1a5   :  { %v143_v63 = vmul.f32 %v214_v61, %v140_v59  ;;  %vm148_vm7 = vweird.f32 %v214_v61 }
 0x1a6   :  { %215 = vrcp.f32 %v141_v62  ;;  %vm149_vm9 = vmor %vm147_vm8, %vm148_vm7  ;;  %v168_v12 = vand.u32 2147483648, %v141_v62  ;;  %v166_v14 = vand.u32 2147483647, %v141_v62  ;;  %vm162_vm12 = vweird.f32 %v141_v62 }
 0x1a7   :  { %v144_v0 = vsub.f32 1.0, %v143_v63 }
 0x1a8   :  { %v169_v16 = vor.u32 1.1754944e-38, %v168_v12  ;;  %vm167_vm14 = vcmp.eq.f32.partialorder %v166_v14, 8.507059e+37 }
 0x1a9   :  { %v145_v2 = vmul.f32 %v214_v61, %v144_v0 }
 0x1ab   :  { %v146_v4 = vadd.f32 %v214_v61, %v145_v2 }
 0x1ac   :  { %v216_v5 = vpop.eup %215 }
 0x1ad   :  { %v150_v7 = vsel %vm149_vm9, %v214_v61, %v146_v4  ;;  %v158_v8 = vmul.f32 %v216_v5, %v141_v62  ;;  %vm163_vm11 = vweird.f32 %v216_v5 }
 0x1ae   :  { %v155_v9 = vsel %vm152_vm10, %v154_v6, %v150_v7  ;;  %vm164_vm13 = vmor %vm162_vm12, %vm163_vm11 }
 0x1af   :  { %v172_v10 = vmul.f32 %v155_v9, %v118_v44  ;;  %v159_v11 = vsub.f32 1.0, %v158_v8 }
 0x1b1   :  { %174 = vst [vmem:[%s269_s3] sm:$0xff] %v172_v10  ;;  %v160_v13 = vmul.f32 %v216_v5, %v159_v11 }
 0x1b3   :  { %v161_v15 = vadd.f32 %v216_v5, %v160_v13 }
 0x1b5   :  { %v165_v17 = vsel %vm164_vm13, %v216_v5, %v161_v15 }
 0x1b6   :  { %v170_v18 = vsel %vm167_vm14, %v169_v16, %v165_v17 }
 0x1b7   :  { %v173_v19 = vmul.f32 %v170_v18, %v119_v54 }
 0x1b9   :  { %175 = vst [vmem:[%s269_s3 + $0x8] sm:$0xff] %v173_v19 }

</bundles_post_ra>
